<compile_context>
chip_gen: v6e
topology: v6e:2x2x1
jax: 0.10.0
libtpu: 0.0.40
codegen_flags: <defaults>
</compile_context>

<pallas_src>
import functools

import jax
import jax.numpy as jnp
from jax.experimental import pallas as pl
from jax.experimental.pallas import tpu as pltpu  # noqa: F401  (TPU backend)


# ------------------------- fused Pallas kernel -------------------------

def make_fused_classifier_kernel(num_layers, n_nodes, agg_first):
    """Build the fused GCN-forward kernel for a static layer count.

    Ref order: ahat, x, (w_i, b_i) * num_layers, wc, bc, out.
    Everything lives in VMEM for the entire forward pass.
    """
    inv_n = 1.0 / float(n_nodes)

    def kernel(*refs):
        ahat = refs[0][...]          # (N, N) normalized adjacency, VMEM-resident
        h = refs[1][...]             # (N, Din) node features
        out_ref = refs[-1]

        pos = 2
        for li in range(num_layers):
            w = refs[pos][...]       # (Din, Dout), true (unpadded) shape
            b = refs[pos + 1][...]   # (1, Dout)
            pos += 2
            if agg_first[li]:
                # (Ahat @ H) @ W : cheaper when Din <= Dout
                z = jnp.dot(
                    jnp.dot(ahat, h, preferred_element_type=jnp.float32),
                    w, preferred_element_type=jnp.float32)
            else:
                # Ahat @ (H @ W) : cheaper when Din > Dout
                z = jnp.dot(
                    ahat,
                    jnp.dot(h, w, preferred_element_type=jnp.float32),
                    preferred_element_type=jnp.float32)
            h = jnp.maximum(z + b, 0.0)

        wc = refs[pos][...]          # (Hid, C)
        bc = refs[pos + 1][...]      # (1, C)

        # Mean-node readout on the XLU (sublane reduce) with the 1/N scale
        # folded in; classifier dot on the MXU.
        hg = jnp.sum(h, axis=0, keepdims=True) * inv_n          # (1, Hid)
        out_ref[...] = jnp.dot(hg, wc, preferred_element_type=jnp.float32) + bc

    return kernel


# ------------------------- one-time parameter prep -------------------------

def prepare_params(params):
    """Hoisted out of the hot path: flatten params into kernel-ready arrays
    (biases as (1, D) rows) and decide per-layer matmul order from the REAL
    shapes. Call once at init; reuse the result for every forward."""
    flat = []
    agg_first = []
    for (w, b) in params["convs"]:
        flat.append(w)
        flat.append(b.reshape(1, -1))
        agg_first.append(w.shape[0] <= w.shape[1])
    flat.append(params["wc"])
    flat.append(params["bc"].reshape(1, -1))
    return tuple(flat), tuple(agg_first)


# ------------------------- wrapper -------------------------

def classifier_forward(x, ahat, flat_params, *, agg_first):
    """Full forward pass of the Classifier module (eval mode), one pallas_call.

    `flat_params` comes from prepare_params(); the wrapper does zero array
    manipulation — just assembles the pallas_call.
    """
    n_nodes = x.shape[0]
    num_layers = len(agg_first)
    n_classes = flat_params[-1].shape[1]

    inputs = (ahat, x) + flat_params
    in_specs = [pl.BlockSpec(a.shape, lambda: (0, 0)) for a in inputs]

    # Advisory cost estimate (accurate, instead of an inflated vmem limit).
    flops = 0
    din = x.shape[1]
    for li in range(num_layers):
        w = flat_params[2 * li]
        d_in, d_out = w.shape
        if agg_first[li]:
            flops += 2 * n_nodes * n_nodes * d_in + 2 * n_nodes * d_in * d_out
        else:
            flops += 2 * n_nodes * d_in * d_out + 2 * n_nodes * n_nodes * d_out
        din = d_out
    flops += 2 * din * n_classes
    bytes_accessed = sum(int(a.size) * a.dtype.itemsize for a in inputs)
    bytes_accessed += n_classes * 4

    out = pl.pallas_call(
        make_fused_classifier_kernel(num_layers, n_nodes, agg_first),
        out_shape=jax.ShapeDtypeStruct((1, n_classes), jnp.float32),
        in_specs=in_specs,
        out_specs=pl.BlockSpec((1, n_classes), lambda: (0, 0)),
        cost_estimate=pl.CostEstimate(
            flops=flops, transcendentals=0, bytes_accessed=bytes_accessed),
    )(*inputs)
    return out


# ------------------------- pure-JAX reference -------------------------

def classifier_reference(x, ahat, params):
    h = x
    for (w, b) in params["convs"]:
        h = jnp.maximum(ahat @ (h @ w) + b, 0.0)
    hg = jnp.mean(h, axis=0, keepdims=True)
    return hg @ params["wc"] + params["bc"]


# ------------------------- setup / glue -------------------------

def build_graph(key, n_nodes):
    """Deterministic symmetric graph (ring + random edges), normalized adjacency."""
    idx = jnp.arange(n_nodes)
    ring = jnp.zeros((n_nodes, n_nodes), jnp.float32)
    ring = ring.at[idx, (idx + 1) % n_nodes].set(1.0)
    ring = ring.at[(idx + 1) % n_nodes, idx].set(1.0)
    rnd = (jax.random.uniform(key, (n_nodes, n_nodes)) > 0.7).astype(jnp.float32)
    a = jnp.clip(ring + rnd + rnd.T, 0.0, 1.0)
    a = a * (1.0 - jnp.eye(n_nodes, dtype=jnp.float32))  # no self loops (DGL default)
    deg = jnp.sum(a, axis=1)
    dinv = 1.0 / jnp.sqrt(jnp.maximum(deg, 1.0))          # ring guarantees deg >= 2
    ahat = a * dinv[:, None] * dinv[None, :]              # D^{-1/2} A D^{-1/2}
    return ahat


def init_params(key, in_dim, hidden_dim, n_classes, hidden_layers):
    params = {"convs": []}
    dims = [in_dim] + [hidden_dim] * (hidden_layers + 1)
    for i in range(len(dims) - 1):
        key, kw = jax.random.split(key)
        scale = 1.0 / jnp.sqrt(jnp.float32(dims[i]))
        w = scale * jax.random.normal(kw, (dims[i], dims[i + 1]), jnp.float32)
        b = jnp.zeros((dims[i + 1],), jnp.float32)
        params["convs"].append((w, b))
    key, kc = jax.random.split(key)
    scale = 1.0 / jnp.sqrt(jnp.float32(hidden_dim))
    # classifier weight stored pre-transposed: (hidden_dim, n_classes)
    params["wc"] = scale * jax.random.normal(kc, (hidden_dim, n_classes), jnp.float32)
    params["bc"] = jnp.zeros((n_classes,), jnp.float32)
    return params


if __name__ == "__main__":
    N_NODES = 16
    IN_DIM = 8
    HIDDEN_DIM = 32
    N_CLASSES = 4
    HIDDEN_LAYERS = 1   # total GraphConv layers = 1 + HIDDEN_LAYERS = 2

    root = jax.random.PRNGKey(0)
    k_graph, k_feat, k_param = jax.random.split(root, 3)

    ahat = build_graph(k_graph, N_NODES)                                  # (16, 16)
    x = jax.random.normal(k_feat, (N_NODES, IN_DIM), jnp.float32)         # (16, 8)
    params = init_params(k_param, IN_DIM, HIDDEN_DIM, N_CLASSES, HIDDEN_LAYERS)

    # One-time prep (hoisted out of the hot path).
    flat_params, agg_first = prepare_params(params)

    fwd = jax.jit(functools.partial(classifier_forward, agg_first=agg_first))
    logits = fwd(x, ahat, flat_params)                                    # (1, 4)
    jax.block_until_ready(logits)

    ref = classifier_reference(x, ahat, params)

    assert logits.shape == (1, N_CLASSES)
    assert jnp.all(jnp.isfinite(logits))
    assert jnp.allclose(logits, ref, rtol=1e-4, atol=1e-4), (logits, ref)
    print("KERNEL_OK")
</pallas_src>

<mosaic_0001>
module attributes {stable_mosaic.version = 11 : i64} {
  func.func @kernel(%arg0: memref<16x16xf32, #tpu.memory_space<vmem>>, %arg1: memref<16x8xf32, #tpu.memory_space<vmem>>, %arg2: memref<8x32xf32, #tpu.memory_space<vmem>>, %arg3: memref<1x32xf32, #tpu.memory_space<vmem>>, %arg4: memref<32x32xf32, #tpu.memory_space<vmem>>, %arg5: memref<1x32xf32, #tpu.memory_space<vmem>>, %arg6: memref<32x4xf32, #tpu.memory_space<vmem>>, %arg7: memref<1x4xf32, #tpu.memory_space<vmem>>, %arg8: memref<1x4xf32, #tpu.memory_space<vmem>>) attributes {dimension_semantics = [], scalar_prefetch = 0 : i64, scratch_operands = 0 : i64, tpu.core_type = #tpu.core_type<tc>} {
    %c0 = arith.constant 0 : index
    %c0_0 = arith.constant 0 : index
    %0 = vector.load %arg0[%c0, %c0_0] : memref<16x16xf32, #tpu.memory_space<vmem>>, vector<16x16xf32>
    %c0_1 = arith.constant 0 : index
    %c0_2 = arith.constant 0 : index
    %1 = vector.load %arg1[%c0_1, %c0_2] : memref<16x8xf32, #tpu.memory_space<vmem>>, vector<16x8xf32>
    %c0_3 = arith.constant 0 : index
    %c0_4 = arith.constant 0 : index
    %2 = vector.load %arg2[%c0_3, %c0_4] : memref<8x32xf32, #tpu.memory_space<vmem>>, vector<8x32xf32>
    %c0_5 = arith.constant 0 : index
    %c0_6 = arith.constant 0 : index
    %3 = vector.load %arg3[%c0_5, %c0_6] : memref<1x32xf32, #tpu.memory_space<vmem>>, vector<1x32xf32>
    %cst = arith.constant dense<0.000000e+00> : vector<16x8xf32>
    %4 = tpu.matmul %0, %1, %cst {dimension_numbers = #tpu.dot_dimension_numbers<[1], [0], [0], [1], [0, 0, 1, 1], [], []>} : vector<16x16xf32>, vector<16x8xf32>, vector<16x8xf32> -> vector<16x8xf32>
    %cst_7 = arith.constant dense<0.000000e+00> : vector<16x32xf32>
    %5 = tpu.matmul %4, %2, %cst_7 {dimension_numbers = #tpu.dot_dimension_numbers<[1], [0], [0], [1], [0, 0, 1, 1], [], []>} : vector<16x8xf32>, vector<8x32xf32>, vector<16x32xf32> -> vector<16x32xf32>
    %6 = vector.broadcast %3 : vector<1x32xf32> to vector<16x32xf32>
    %7 = arith.addf %5, %6 : vector<16x32xf32>
    %cst_8 = arith.constant 0.000000e+00 : f32
    %8 = vector.broadcast %cst_8 : f32 to vector<16x32xf32>
    %9 = arith.maximumf %7, %8 : vector<16x32xf32>
    %c0_9 = arith.constant 0 : index
    %c0_10 = arith.constant 0 : index
    %10 = vector.load %arg4[%c0_9, %c0_10] : memref<32x32xf32, #tpu.memory_space<vmem>>, vector<32x32xf32>
    %c0_11 = arith.constant 0 : index
    %c0_12 = arith.constant 0 : index
    %11 = vector.load %arg5[%c0_11, %c0_12] : memref<1x32xf32, #tpu.memory_space<vmem>>, vector<1x32xf32>
    %cst_13 = arith.constant dense<0.000000e+00> : vector<16x32xf32>
    %12 = tpu.matmul %0, %9, %cst_13 {dimension_numbers = #tpu.dot_dimension_numbers<[1], [0], [0], [1], [0, 0, 1, 1], [], []>} : vector<16x16xf32>, vector<16x32xf32>, vector<16x32xf32> -> vector<16x32xf32>
    %cst_14 = arith.constant dense<0.000000e+00> : vector<16x32xf32>
    %13 = tpu.matmul %12, %10, %cst_14 {dimension_numbers = #tpu.dot_dimension_numbers<[1], [0], [0], [1], [0, 0, 1, 1], [], []>} : vector<16x32xf32>, vector<32x32xf32>, vector<16x32xf32> -> vector<16x32xf32>
    %14 = vector.broadcast %11 : vector<1x32xf32> to vector<16x32xf32>
    %15 = arith.addf %13, %14 : vector<16x32xf32>
    %cst_15 = arith.constant 0.000000e+00 : f32
    %16 = vector.broadcast %cst_15 : f32 to vector<16x32xf32>
    %17 = arith.maximumf %15, %16 : vector<16x32xf32>
    %c0_16 = arith.constant 0 : index
    %c0_17 = arith.constant 0 : index
    %18 = vector.load %arg6[%c0_16, %c0_17] : memref<32x4xf32, #tpu.memory_space<vmem>>, vector<32x4xf32>
    %c0_18 = arith.constant 0 : index
    %c0_19 = arith.constant 0 : index
    %19 = vector.load %arg7[%c0_18, %c0_19] : memref<1x4xf32, #tpu.memory_space<vmem>>, vector<1x4xf32>
    %cst_20 = arith.constant dense<0.000000e+00> : vector<32xf32>
    %20 = vector.multi_reduction <add>, %17, %cst_20 [0] : vector<16x32xf32> to vector<32xf32>
    %21 = vector.shape_cast %20 : vector<32xf32> to vector<1x32xf32>
    %cst_21 = arith.constant 6.250000e-02 : f32
    %22 = vector.broadcast %cst_21 : f32 to vector<1x32xf32>
    %23 = arith.mulf %21, %22 : vector<1x32xf32>
    %cst_22 = arith.constant dense<0.000000e+00> : vector<1x4xf32>
    %24 = tpu.matmul %23, %18, %cst_22 {dimension_numbers = #tpu.dot_dimension_numbers<[1], [0], [0], [1], [0, 0, 1, 1], [], []>} : vector<1x32xf32>, vector<32x4xf32>, vector<1x4xf32> -> vector<1x4xf32>
    %25 = arith.addf %24, %19 : vector<1x4xf32>
    %c0_23 = arith.constant 0 : index
    %c0_24 = arith.constant 0 : index
    %26 = vector.load %arg8[%c0_23, %c0_24] : memref<1x4xf32, #tpu.memory_space<vmem>>, vector<1x4xf32>
    tpu.vector_store %arg8[%c0_23, %c0_24], %25 {strides = array<i32>} : memref<1x4xf32, #tpu.memory_space<vmem>>, vector<1x4xf32>,
    return
  }
}

</mosaic_0001>

<bundles_post_ra>
// kernel: classifier_forward.1
= control target key start
LH: loop header
LB: loop body
LE: loop exit
PB: predicated region body
PF: predicated region fallthrough
CT: control target
= control target key end

     0   :  { %vm36_vm0 = vcmask 130048   ;;  %s689_s0 = inlined_call_operand.vmem [shape: f32[16,16], index: 0, kind: input, shape index: {}]   ;;  %s690_s1 = inlined_call_operand.vmem [shape: f32[16,8], index: 1, kind: input, shape index: {}]   ;;  %s691_s2 = inlined_call_operand.vmem [shape: f32[8,32], index: 2, kind: input, shape index: {}]   ;;  %s692_s3 = inlined_call_operand.vmem [shape: f32[1,32], index: 3, kind: input, shape index: {}]   ;;  %s693_s4 = inlined_call_operand.vmem [shape: f32[32,32], index: 4, kind: input, shape index: {}]   ;;  %s694_s5 = inlined_call_operand.vmem [shape: f32[1,32], index: 5, kind: input, shape index: {}]   ;;  %s695_s6 = inlined_call_operand.vmem [shape: f32[32,4], index: 6, kind: input, shape index: {}]   ;;  %s696_s7 = inlined_call_operand.vmem [shape: f32[1,4], index: 7, kind: input, shape index: {}]   ;;  %s697_s8 = inlined_call_operand.hbm [shape: f32[1,4], index: 8, kind: output, shape index: {}]  }
   0x1   :  { %v33_v0 = vld [vmem:[%s690_s1 + $0x8] sm:$0xff]  ;;  %v32_v1 = vld [vmem:[%s690_s1] sm:$0xff] }
   0x2   :  { %v30_v2 = vld [vmem:[%s689_s0] sm:$0xff]  ;;  %515 = vmatprep.subr.mxu0 %v33_v0 }
   0x3   :  { %519 = vmatprep.mubr.msk.f32.mxu0 %vm36_vm0, %v30_v2 }
   0x4   :  { %13 = vsyncpa [#allocation3], 0  ;;  %516 = vmatpush3.msra.mxu0 %v33_v0  ;;  %v31_v3 = vld [vmem:[%s689_s0 + $0x8] sm:$0xff]  ;;  %v34_v4 = vld [vmem:[%s691_s2] sm:$0xff]  ;;  %vm124_vm1 = vcmask 64512   ;;  %vm294_vm2 = vcmask 261120  }
   0x5   :  { %517 = vmatprep.subr.mxu0 %v32_v1  ;;  %522 = vmatprep.subr.mxu1 %v34_v4  ;;  %v211_v7 = vld [vmem:[%s693_s4 + $0x18] sm:$0xff]  ;;  %v210_v8 = vld [vmem:[%s693_s4 + $0x10] sm:$0xff]  ;;  %v484_v9 = vld [vmem:[%s692_s3] ss:$0 sm:$0xff]  ;;  %v581_v20 = vmov 0.0   ;;  %vm582_vm3 = vmmov 0  }
   0x6   :  { %518 = vmatpush3.msra.mxu0 %v32_v1  ;;  %523 = vmatpush3.msra.mxu1 %v34_v4  ;;  %v209_v16 = vld [vmem:[%s693_s4 + $0x8] sm:$0xff]  ;;  %v208_v17 = vld [vmem:[%s693_s4] sm:$0xff]  ;;  %v381_v21 = vld [vmem:[%s695_s6 + $0x18] sm:$0xff]  ;;  %s583_s30 = smov [#allocation2]   ;;  %vm466_vm4 = vcmask 24576  }
   0x7   :  { %520 = vmatmul.mubr.msk.f32.vlgmr.msra.gmra.mxu0 %vm36_vm0, %v31_v3  ;;  %534 = vmatprep.subr.mxu0 %v211_v7  ;;  %v380_v22 = vld [vmem:[%s695_s6 + $0x10] sm:$0xff]  ;;  %v379_v23 = vld [vmem:[%s695_s6 + $0x8] sm:$0xff]  ;;  %v378_v24 = vld [vmem:[%s695_s6] sm:$0xff]  ;;  %s474_s9 = sshll.u32 %s583_s30, 4  ;;  %s475_s9 = int_to_ptr.vmem [resolvable:$true] %s474_s9 }
   0x8   :  { %535 = vmatpush3.msra.mxu0 %v211_v7  ;;  %v489_v25 = vld [vmem:[%s694_s5] ss:$0 sm:$0xff]  ;;  %s559_s10 = scalar_lea.vmem %s475_s9, 16  ;;  %s563_s11 = scalar_lea.vmem %s475_s9, 32 }
   0x9   :  { %536 = vmatprep.subr.mxu0 %v210_v8  ;;  %v382_v42 = vld [vmem:[%s696_s7] sm:$0x1]  ;;  %p560_p0 = scmp.ne.s32.totalorder %s475_s9, %s559_s10  ;;  %p564_p1 = scmp.lt.s32.totalorder %s475_s9, %s475_s9 }
   0xa   :  { %537 = vmatpush3.msra.mxu0 %v210_v8  ;;  %p565_p2 = scmp.lt.s32.totalorder %s563_s11, %s559_s10 }
   0xb   :  { %538 = vmatprep.subr.mxu0 %v209_v16 }
   0xc   :  { %539 = vmatpush3.msra.mxu0 %v209_v16  ;;  %p566_p3 = por %p565_p2, %p564_p1 }
   0xd   :  { %540 = vmatprep.subr.mxu0 %v208_v17 }
   0xe   :  { %541 = vmatpush3.msra.mxu0 %v208_v17  ;;  %p567_p4 = pnand %p566_p3, %p560_p0 }
  0xc7   :  { %v521_v5 = vpop.f32.mrf.mxu0 }
  0xc9   :  { %v109_v6 = vpop.f32.mrf.mxu0 }
  0xca   :  { %524 = vmatprep.mubr.msk.f32.mxu1 %vm124_vm1, %v109_v6 }
  0xcb   :  { %525 = vmatmul.mubr.msk.f32.vlgmr.msra.gmra.mxu1 %vm124_vm1, %v521_v5 }
  0xcc   :  { %531 = vmatprep.mubr.msk.f32.mxu1 %vm36_vm0, %v30_v2 }
 0x18b   :  { %v526_v10 = vpop.f32.mrf.mxu1 }
 0x18c   :  { %v203_v11 = vadd.f32 %v526_v10, %v484_v9 }
 0x18d   :  { %v197_v12 = vpop.f32.mrf.mxu1 }
 0x18e   :  { %v207_v13 = vmax.f32 %v203_v11, 0.0  ;;  %v198_v14 = vadd.f32 %v484_v9, %v197_v12 }
 0x190   :  { %v206_v15 = vmax.f32 %v198_v14, 0.0  ;;  %527 = vmatprep.subr.mxu1 %v207_v13 }
 0x191   :  { %528 = vmatpush3.msra.mxu1 %v207_v13 }
 0x192   :  { %529 = vmatprep.subr.mxu1 %v206_v15 }
 0x193   :  { %530 = vmatpush3.msra.mxu1 %v206_v15 }
 0x194   :  { %532 = vmatmul.mubr.msk.f32.vlgmr.msra.gmra.mxu1 %vm36_vm0, %v31_v3  ;;  %545 = vmatprep.subr.mxu1 %v581_v20 }
 0x195   :  { %546 = vmatpush3.msra.mxu1 %v381_v21  ;;  %553 = vmatprep.mubr.msk.f32.mxu1 %vm582_vm3, %v581_v20 }
 0x196   :  { %547 = vmatprep.subr.mxu1 %v581_v20 }
 0x197   :  { %548 = vmatpush3.msra.mxu1 %v380_v22 }
 0x198   :  { %549 = vmatprep.subr.mxu1 %v581_v20 }
 0x199   :  { %550 = vmatpush3.msra.mxu1 %v379_v23 }
 0x19a   :  { %551 = vmatprep.subr.mxu1 %v581_v20 }
 0x19b   :  { %552 = vmatpush3.msra.mxu1 %v378_v24 }
 0x254   :  { %v533_v18 = vpop.f32.mrf.mxu1 }
 0x256   :  { %v279_v19 = vpop.f32.mrf.mxu1 }
 0x257   :  { %542 = vmatprep.mubr.msk.f32.mxu0 %vm294_vm2, %v279_v19 }
 0x258   :  { %543 = vmatmul.mubr.msk.f32.vlgmr.msra.gmra.mxu0 %vm294_vm2, %v533_v18 }
 0x318   :  { %v544_v26 = vpop.f32.mrf.mxu0 }
 0x319   :  { %v373_v27 = vadd.f32 %v544_v26, %v489_v25 }
 0x31a   :  { %v367_v28 = vpop.f32.mrf.mxu0 }
 0x31b   :  { %v377_v29 = vmax.f32 %v373_v27, 0.0  ;;  %v368_v30 = vadd.f32 %v489_v25, %v367_v28 }
 0x31d   :  { %v376_v31 = vmax.f32 %v368_v30, 0.0  ;;  %v384_v32 = vsel %vm294_vm2, %v377_v29, 0.0 }
 0x31f   :  { %v383_v33 = vsel %vm294_vm2, %v376_v31, 0.0 }
 0x320   :  { %v385_v34 = vadd.f32 %v384_v32, %v383_v33 }
 0x322   :  { %v386_v35 = vrot.slane %v385_v34, 4 }
 0x324   :  { %v387_v36 = vadd.f32 %v386_v35, %v385_v34 }
 0x326   :  { %v388_v37 = vrot.slane %v387_v36, 2 }
 0x328   :  { %v389_v38 = vadd.f32 %v388_v37, %v387_v36 }
 0x32a   :  { %v390_v39 = vrot.slane %v389_v38, 1 }
 0x32c   :  { %v391_v40 = vadd.f32 %v390_v39, %v389_v38 }
 0x32e   :  { %v392_v41 = vmul.f32 0.0625, %v391_v40 }
 0x330   :  { %554 = vmatmul.mubr.msk.f32.vlgmr.msra.gmra.mxu1 %vm294_vm2, %v392_v41 }
 0x3f0   :  { %v462_v43 = vpop.f32.mrf.mxu1 }
 0x3f1   :  { %v463_v44 = vadd.f32 %v462_v43, %v382_v42 }
 0x3f2   :  { %v555_v45 = vpop.f32.mrf.mxu1 }
 0x3f3   :  { %467 = vst.msk [vmem:[#allocation2] sm:$0x1] %vm466_vm4, %v463_v44 }
 0x3f4   :  { %570 = shalt.err (!%p567_p4)
}
 0x3f5   :  { %477 = dma.vmem_to_hbm [thread:$0]  %s475_s9, 16, %s697_s8, [#allocation3]  }
 0x3f6   :  { %579 = dma.done.wait [#allocation3], 16  }
 0x3f7   :  { %580 = vsyncadd [#allocation3], 4294967280 }
 0x3f8   :  { %481 = vsyncpa [#allocation3], 1 }

</bundles_post_ra>
